<compile_context>
chip_gen: v7x
topology: tpu7x:2x2x1
jax: 0.10.0
libtpu: 0.0.40
codegen_flags: <defaults>
</compile_context>

<pallas_src>
import functools

import jax
import jax.numpy as jnp
from jax import lax
from jax.experimental import pallas as pl
from jax.experimental.pallas import tpu as pltpu


def _pick_lane_tile(n, cap=2048):
    """Largest multiple-of-128 divisor of n that is <= cap (else the full dim)."""
    if n % 128 != 0 or n <= cap:
        return n
    for t in range(cap, 0, -128):
        if n % t == 0:
            return t
    return n


# --------------------------------------------------------------------------- #
# Kernel 1: fused g / theta / phi 1x1-conv projections (channels-first matmul)
# --------------------------------------------------------------------------- #
def _proj_kernel(x_ref, wg_ref, bg_ref, wt_ref, bt_ref, wp_ref, bp_ref,
                 g_ref, th_ref, ph_ref):
    x = x_ref[...].astype(jnp.float32)                       # (C, T)

    def conv(w_ref, b_ref):
        w = w_ref[...].astype(jnp.float32)                   # (Ci, C)
        b = b_ref[...].astype(jnp.float32)                   # (Ci, 1)
        return jnp.dot(w, x, preferred_element_type=jnp.float32) + b

    g_ref[...] = conv(wg_ref, bg_ref).astype(g_ref.dtype)
    th_ref[...] = conv(wt_ref, bt_ref).astype(th_ref.dtype)
    ph_ref[...] = conv(wp_ref, bp_ref).astype(ph_ref.dtype)


def _projections(x2d, w_g, b_g, w_t, b_t, w_p, b_p):
    B, C, HW = x2d.shape
    ci = w_g.shape[0]
    t = _pick_lane_tile(HW)
    grid = (B, HW // t)
    out = jax.ShapeDtypeStruct((B, ci, HW), x2d.dtype)
    return pl.pallas_call(
        _proj_kernel,
        out_shape=(out, out, out),
        grid_spec=pltpu.PrefetchScalarGridSpec(
            num_scalar_prefetch=0,
            grid=grid,
            in_specs=[
                pl.BlockSpec((None, C, t), lambda b, s: (b, 0, s)),
                pl.BlockSpec((ci, C), lambda b, s: (0, 0)),
                pl.BlockSpec((ci, 1), lambda b, s: (0, 0)),
                pl.BlockSpec((ci, C), lambda b, s: (0, 0)),
                pl.BlockSpec((ci, 1), lambda b, s: (0, 0)),
                pl.BlockSpec((ci, C), lambda b, s: (0, 0)),
                pl.BlockSpec((ci, 1), lambda b, s: (0, 0)),
            ],
            out_specs=[
                pl.BlockSpec((None, ci, t), lambda b, s: (b, 0, s)),
                pl.BlockSpec((None, ci, t), lambda b, s: (b, 0, s)),
                pl.BlockSpec((None, ci, t), lambda b, s: (b, 0, s)),
            ],
        ),
        compiler_params=pltpu.CompilerParams(
            dimension_semantics=("parallel", "parallel")),
    )(x2d, w_g, b_g.reshape(ci, 1), w_t, b_t.reshape(ci, 1),
      w_p, b_p.reshape(ci, 1))


# --------------------------------------------------------------------------- #
# Kernel 2: BN-affine(theta, phi) -> attention -> y -> W 1x1-conv   (per batch)
# --------------------------------------------------------------------------- #
def _attn_kernel(g_ref, th_ref, ph_ref,
                 sth_ref, dth_ref, sph_ref, dph_ref,
                 ww_ref, bw_ref, o_ref):
    g = g_ref[...].astype(jnp.float32)                                    # (Ci, HW)
    th = th_ref[...].astype(jnp.float32) * sth_ref[...].astype(jnp.float32) \
        + dth_ref[...].astype(jnp.float32)                                # (Ci, HW)
    ph = ph_ref[...].astype(jnp.float32) * sph_ref[...].astype(jnp.float32) \
        + dph_ref[...].astype(jnp.float32)                                # (Ci, HW)

    # f[i, j] = sum_c theta[c, i] * phi[c, j]   -> (HW, HW)
    f = lax.dot_general(th, ph, (((0,), (0,)), ((), ())),
                        preferred_element_type=jnp.float32)
    f = f - jnp.max(f, axis=-1, keepdims=True)
    p = jnp.exp(f)
    p = p / jnp.sum(p, axis=-1, keepdims=True)                            # softmax_j

    # y[c, i] = sum_j g[c, j] * p[i, j]         -> (Ci, HW)
    y = lax.dot_general(g, p, (((1,), (1,)), ((), ())),
                        preferred_element_type=jnp.float32)

    # W 1x1 conv: (C, Ci) @ (Ci, HW) + (C, 1)
    ww = ww_ref[...].astype(jnp.float32)
    bw = bw_ref[...].astype(jnp.float32)
    wy = jnp.dot(ww, y, preferred_element_type=jnp.float32) + bw
    o_ref[...] = wy.astype(o_ref.dtype)


def _attention_and_w(g, th, ph, s_th, d_th, s_ph, d_ph, w_w, b_w):
    B, ci, HW = g.shape
    C = w_w.shape[0]
    return pl.pallas_call(
        _attn_kernel,
        out_shape=jax.ShapeDtypeStruct((B, C, HW), g.dtype),
        grid_spec=pltpu.PrefetchScalarGridSpec(
            num_scalar_prefetch=0,
            grid=(B,),
            in_specs=[
                pl.BlockSpec((None, ci, HW), lambda b: (b, 0, 0)),
                pl.BlockSpec((None, ci, HW), lambda b: (b, 0, 0)),
                pl.BlockSpec((None, ci, HW), lambda b: (b, 0, 0)),
                pl.BlockSpec((ci, 1), lambda b: (0, 0)),
                pl.BlockSpec((ci, 1), lambda b: (0, 0)),
                pl.BlockSpec((ci, 1), lambda b: (0, 0)),
                pl.BlockSpec((ci, 1), lambda b: (0, 0)),
                pl.BlockSpec((C, ci), lambda b: (0, 0)),
                pl.BlockSpec((C, 1), lambda b: (0, 0)),
            ],
            out_specs=pl.BlockSpec((None, C, HW), lambda b: (b, 0, 0)),
        ),
        compiler_params=pltpu.CompilerParams(
            dimension_semantics=("parallel",)),
    )(g, th, ph, s_th, d_th, s_ph, d_ph, w_w, b_w.reshape(C, 1))


# --------------------------------------------------------------------------- #
# Kernel 3: BN-affine(W_y) + residual add
# --------------------------------------------------------------------------- #
def _bn_residual_kernel(wy_ref, x_ref, s_ref, d_ref, o_ref):
    wy = wy_ref[...].astype(jnp.float32)
    x = x_ref[...].astype(jnp.float32)
    s = s_ref[...].astype(jnp.float32)
    d = d_ref[...].astype(jnp.float32)
    o_ref[...] = (wy * s + d + x).astype(o_ref.dtype)


def _bn_residual(wy, x2d, scale, shift):
    B, C, HW = wy.shape
    t = _pick_lane_tile(HW)
    return pl.pallas_call(
        _bn_residual_kernel,
        out_shape=jax.ShapeDtypeStruct((B, C, HW), x2d.dtype),
        grid_spec=pltpu.PrefetchScalarGridSpec(
            num_scalar_prefetch=0,
            grid=(B, HW // t),
            in_specs=[
                pl.BlockSpec((None, C, t), lambda b, s: (b, 0, s)),
                pl.BlockSpec((None, C, t), lambda b, s: (b, 0, s)),
                pl.BlockSpec((C, 1), lambda b, s: (0, 0)),
                pl.BlockSpec((C, 1), lambda b, s: (0, 0)),
            ],
            out_specs=pl.BlockSpec((None, C, t), lambda b, s: (b, 0, s)),
        ),
        compiler_params=pltpu.CompilerParams(
            dimension_semantics=("parallel", "parallel")),
    )(wy, x2d, scale, shift)


# --------------------------------------------------------------------------- #
# Module
# --------------------------------------------------------------------------- #
class NonLocal2D:
    """JAX/Pallas port of the PyTorch NonLocal2D module (forward pass)."""

    def __init__(self, in_channels, inter_channels=None, dimension=2,
                 sub_sample=False, bn_layer=True, key=None, bn_eps=1e-5):
        assert dimension == 2
        self.in_channels = in_channels
        self.inter_channels = inter_channels
        if self.inter_channels is None:
            self.inter_channels = in_channels // 2
            if self.inter_channels == 0:
                self.inter_channels = 1
        # NOTE: the reference module builds a MaxPool2d when sub_sample=True but
        # never applies it in forward(); we mirror that (no pooling).
        self.sub_sample = sub_sample
        self.bn_eps = bn_eps

        if key is None:
            key = jax.random.PRNGKey(0)
        kg, kth, kph, kw = jax.random.split(key, 4)
        c, ci = in_channels, self.inter_channels
        s_in = 1.0 / jnp.sqrt(jnp.float32(c))
        s_ci = 1.0 / jnp.sqrt(jnp.float32(ci))
        # 1x1 conv weights stored as (out, in) matrices.
        self.w_g = jax.random.normal(kg, (ci, c), jnp.float32) * s_in
        self.b_g = jnp.zeros((ci,), jnp.float32)
        self.w_theta = jax.random.normal(kth, (ci, c), jnp.float32) * s_in
        self.b_theta = jnp.zeros((ci,), jnp.float32)
        self.w_phi = jax.random.normal(kph, (ci, c), jnp.float32) * s_in
        self.b_phi = jnp.zeros((ci,), jnp.float32)
        self.w_w = jax.random.normal(kw, (c, ci), jnp.float32) * s_ci
        self.b_w = jnp.zeros((c,), jnp.float32)
        # BatchNorm affine params (PyTorch defaults; W's BN zero-initialized
        # exactly like the reference module's nn.init.constant_).
        self.bn_theta_weight = jnp.ones((ci,), jnp.float32)
        self.bn_theta_bias = jnp.zeros((ci,), jnp.float32)
        self.bn_phi_weight = jnp.ones((ci,), jnp.float32)
        self.bn_phi_bias = jnp.zeros((ci,), jnp.float32)
        self.bn_w_weight = jnp.zeros((c,), jnp.float32)
        self.bn_w_bias = jnp.zeros((c,), jnp.float32)

    def _bn_scale_shift(self, t, gamma, beta):
        # Training-mode BatchNorm2d: per-channel batch statistics over (B, H*W),
        # folded into a per-channel affine (scale, shift).
        mu = jnp.mean(t, axis=(0, 2))
        var = jnp.var(t, axis=(0, 2))
        scale = gamma / jnp.sqrt(var + self.bn_eps)
        shift = beta - mu * scale
        return scale, shift

    def __call__(self, x, return_nl_map=False):
        if return_nl_map:
            raise NotImplementedError(
                "return_nl_map=True is not supported by the fused kernel")
        B, C, H, W = x.shape
        ci = self.inter_channels
        HW = H * W
        x2d = x.reshape(B, C, HW)                      # channels-first, lane = HW

        # 1) fused g / theta / phi projections (Pallas).
        g_raw, th_raw, ph_raw = _projections(
            x2d, self.w_g, self.b_g, self.w_theta, self.b_theta,
            self.w_phi, self.b_phi)

        # 2) BN(train) stats for theta/phi -> per-channel scale/shift (tiny jnp reductions).
        s_th, d_th = self._bn_scale_shift(th_raw, self.bn_theta_weight, self.bn_theta_bias)
        s_ph, d_ph = self._bn_scale_shift(ph_raw, self.bn_phi_weight, self.bn_phi_bias)

        # 3) fused attention + W 1x1-conv (Pallas).
        wy = _attention_and_w(
            g_raw, th_raw, ph_raw,
            s_th.reshape(ci, 1), d_th.reshape(ci, 1),
            s_ph.reshape(ci, 1), d_ph.reshape(ci, 1),
            self.w_w, self.b_w)                         # (B, C, HW)

        # 4) BN(train) stats for W's BatchNorm, then fused affine + residual (Pallas).
        s_w, d_w = self._bn_scale_shift(wy, self.bn_w_weight, self.bn_w_bias)
        z = _bn_residual(wy, x2d, s_w.reshape(C, 1), d_w.reshape(C, 1))
        return z.reshape(B, C, H, W)


# --------------------------------------------------------------------------- #
# Pure-JAX reference (mirrors the PyTorch forward, training-mode BatchNorm)
# --------------------------------------------------------------------------- #
def _reference_nonlocal(x, m):
    B, C, H, W = x.shape
    HW = H * W
    x2 = x.reshape(B, C, HW)

    def conv1x1(t, w, b):
        return jnp.einsum('oc,bcn->bon', w, t) + b[None, :, None]

    def bn_train(t, gamma, beta):
        mu = jnp.mean(t, axis=(0, 2), keepdims=True)
        var = jnp.var(t, axis=(0, 2), keepdims=True)
        return (t - mu) / jnp.sqrt(var + m.bn_eps) * gamma[None, :, None] \
            + beta[None, :, None]

    g_x = conv1x1(x2, m.w_g, m.b_g)
    th = bn_train(conv1x1(x2, m.w_theta, m.b_theta), m.bn_theta_weight, m.bn_theta_bias)
    ph = bn_train(conv1x1(x2, m.w_phi, m.b_phi), m.bn_phi_weight, m.bn_phi_bias)
    f = jnp.einsum('bci,bcj->bij', th, ph)
    p = jax.nn.softmax(f, axis=-1)
    y = jnp.einsum('bij,bcj->bci', p, g_x)
    wy = bn_train(conv1x1(y, m.w_w, m.b_w), m.bn_w_weight, m.bn_w_bias)
    return (wy + x2).reshape(B, C, H, W)


if __name__ == "__main__":
    key = jax.random.PRNGKey(0)
    kx, kp = jax.random.split(key)
    B, C, H, W = 2, 4, 16, 16
    x = jax.random.normal(kx, (B, C, H, W), dtype=jnp.float32)

    nl = NonLocal2D(C, key=kp)

    # (a) Default init: W's BatchNorm is zero-initialized -> z == x exactly.
    z0 = jax.block_until_ready(nl(x))
    assert z0.shape == x.shape and z0.dtype == x.dtype
    assert float(jnp.max(jnp.abs(z0 - x))) < 1e-5

    # (b) Non-trivial W-BN affine so the full attention path is exercised,
    #     checked against the pure-JAX reference.
    nl.bn_w_weight = jnp.linspace(0.5, 1.5, C, dtype=jnp.float32)
    nl.bn_w_bias = jnp.linspace(-0.2, 0.2, C, dtype=jnp.float32)
    z1 = jax.block_until_ready(nl(x))
    z_ref = _reference_nonlocal(x, nl)
    err = float(jnp.max(jnp.abs(z1 - z_ref)))
    assert err < 1e-4, f"max abs error {err}"

    print("KERNEL_OK")
</pallas_src>

<mosaic_0001>
module attributes {stable_mosaic.version = 11 : i64} {
  func.func @_proj_kernel(%arg0: i32, %arg1: i32, %arg2: memref<1x4x256xf32, #tpu.memory_space<vmem>>, %arg3: memref<2x4xf32, #tpu.memory_space<vmem>>, %arg4: memref<2x1xf32, #tpu.memory_space<vmem>>, %arg5: memref<2x4xf32, #tpu.memory_space<vmem>>, %arg6: memref<2x1xf32, #tpu.memory_space<vmem>>, %arg7: memref<2x4xf32, #tpu.memory_space<vmem>>, %arg8: memref<2x1xf32, #tpu.memory_space<vmem>>, %arg9: memref<1x2x256xf32, #tpu.memory_space<vmem>>, %arg10: memref<1x2x256xf32, #tpu.memory_space<vmem>>, %arg11: memref<1x2x256xf32, #tpu.memory_space<vmem>>) attributes {dimension_semantics = [#tpu.dimension_semantics<parallel>, #tpu.dimension_semantics<parallel>], iteration_bounds = array<i64: 2, 1>, scalar_prefetch = 0 : i64, scratch_operands = 0 : i64, tpu.core_type = #tpu.core_type<tc>, window_params = [{transform_indices = @transform_0, window_bounds = array<i64: 1, 4, 256>}, {pipeline_mode = #tpu.pipeline_mode<synchronous>, transform_indices = @transform_1, window_bounds = array<i64: 2, 4>}, {pipeline_mode = #tpu.pipeline_mode<synchronous>, transform_indices = @transform_2, window_bounds = array<i64: 2, 1>}, {pipeline_mode = #tpu.pipeline_mode<synchronous>, transform_indices = @transform_3, window_bounds = array<i64: 2, 4>}, {pipeline_mode = #tpu.pipeline_mode<synchronous>, transform_indices = @transform_4, window_bounds = array<i64: 2, 1>}, {pipeline_mode = #tpu.pipeline_mode<synchronous>, transform_indices = @transform_5, window_bounds = array<i64: 2, 4>}, {pipeline_mode = #tpu.pipeline_mode<synchronous>, transform_indices = @transform_6, window_bounds = array<i64: 2, 1>}, {transform_indices = @transform_7, window_bounds = array<i64: 1, 2, 256>}, {transform_indices = @transform_8, window_bounds = array<i64: 1, 2, 256>}, {transform_indices = @transform_9, window_bounds = array<i64: 1, 2, 256>}]} {
    %c0 = arith.constant 0 : index
    %c0_0 = arith.constant 0 : index
    %c0_1 = arith.constant 0 : index
    %0 = vector.load %arg2[%c0, %c0_0, %c0_1] : memref<1x4x256xf32, #tpu.memory_space<vmem>>, vector<1x4x256xf32>
    %1 = vector.shape_cast %0 : vector<1x4x256xf32> to vector<4x256xf32>
    %c0_2 = arith.constant 0 : index
    %c0_3 = arith.constant 0 : index
    %2 = vector.load %arg3[%c0_2, %c0_3] : memref<2x4xf32, #tpu.memory_space<vmem>>, vector<2x4xf32>
    %c0_4 = arith.constant 0 : index
    %c0_5 = arith.constant 0 : index
    %3 = vector.load %arg4[%c0_4, %c0_5] : memref<2x1xf32, #tpu.memory_space<vmem>>, vector<2x1xf32>
    %cst = arith.constant dense<0.000000e+00> : vector<2x256xf32>
    %4 = tpu.matmul %2, %1, %cst {dimension_numbers = #tpu.dot_dimension_numbers<[1], [0], [0], [1], [0, 0, 1, 1], [], []>} : vector<2x4xf32>, vector<4x256xf32>, vector<2x256xf32> -> vector<2x256xf32>
    %5 = vector.broadcast %3 : vector<2x1xf32> to vector<2x256xf32>
    %6 = arith.addf %4, %5 : vector<2x256xf32>
    %c0_6 = arith.constant 0 : index
    %c0_7 = arith.constant 0 : index
    %c0_8 = arith.constant 0 : index
    %7 = vector.load %arg9[%c0_6, %c0_7, %c0_8] : memref<1x2x256xf32, #tpu.memory_space<vmem>>, vector<1x2x256xf32>
    %8 = vector.shape_cast %7 : vector<1x2x256xf32> to vector<2x256xf32>
    %9 = vector.shape_cast %6 : vector<2x256xf32> to vector<1x2x256xf32>
    tpu.vector_store %arg9[%c0_6, %c0_7, %c0_8], %9 {strides = array<i32>} : memref<1x2x256xf32, #tpu.memory_space<vmem>>, vector<1x2x256xf32>,
    %c0_9 = arith.constant 0 : index
    %c0_10 = arith.constant 0 : index
    %10 = vector.load %arg5[%c0_9, %c0_10] : memref<2x4xf32, #tpu.memory_space<vmem>>, vector<2x4xf32>
    %c0_11 = arith.constant 0 : index
    %c0_12 = arith.constant 0 : index
    %11 = vector.load %arg6[%c0_11, %c0_12] : memref<2x1xf32, #tpu.memory_space<vmem>>, vector<2x1xf32>
    %cst_13 = arith.constant dense<0.000000e+00> : vector<2x256xf32>
    %12 = tpu.matmul %10, %1, %cst_13 {dimension_numbers = #tpu.dot_dimension_numbers<[1], [0], [0], [1], [0, 0, 1, 1], [], []>} : vector<2x4xf32>, vector<4x256xf32>, vector<2x256xf32> -> vector<2x256xf32>
    %13 = vector.broadcast %11 : vector<2x1xf32> to vector<2x256xf32>
    %14 = arith.addf %12, %13 : vector<2x256xf32>
    %c0_14 = arith.constant 0 : index
    %c0_15 = arith.constant 0 : index
    %c0_16 = arith.constant 0 : index
    %15 = vector.load %arg10[%c0_14, %c0_15, %c0_16] : memref<1x2x256xf32, #tpu.memory_space<vmem>>, vector<1x2x256xf32>
    %16 = vector.shape_cast %15 : vector<1x2x256xf32> to vector<2x256xf32>
    %17 = vector.shape_cast %14 : vector<2x256xf32> to vector<1x2x256xf32>
    tpu.vector_store %arg10[%c0_14, %c0_15, %c0_16], %17 {strides = array<i32>} : memref<1x2x256xf32, #tpu.memory_space<vmem>>, vector<1x2x256xf32>,
    %c0_17 = arith.constant 0 : index
    %c0_18 = arith.constant 0 : index
    %18 = vector.load %arg7[%c0_17, %c0_18] : memref<2x4xf32, #tpu.memory_space<vmem>>, vector<2x4xf32>
    %c0_19 = arith.constant 0 : index
    %c0_20 = arith.constant 0 : index
    %19 = vector.load %arg8[%c0_19, %c0_20] : memref<2x1xf32, #tpu.memory_space<vmem>>, vector<2x1xf32>
    %cst_21 = arith.constant dense<0.000000e+00> : vector<2x256xf32>
    %20 = tpu.matmul %18, %1, %cst_21 {dimension_numbers = #tpu.dot_dimension_numbers<[1], [0], [0], [1], [0, 0, 1, 1], [], []>} : vector<2x4xf32>, vector<4x256xf32>, vector<2x256xf32> -> vector<2x256xf32>
    %21 = vector.broadcast %19 : vector<2x1xf32> to vector<2x256xf32>
    %22 = arith.addf %20, %21 : vector<2x256xf32>
    %c0_22 = arith.constant 0 : index
    %c0_23 = arith.constant 0 : index
    %c0_24 = arith.constant 0 : index
    %23 = vector.load %arg11[%c0_22, %c0_23, %c0_24] : memref<1x2x256xf32, #tpu.memory_space<vmem>>, vector<1x2x256xf32>
    %24 = vector.shape_cast %23 : vector<1x2x256xf32> to vector<2x256xf32>
    %25 = vector.shape_cast %22 : vector<2x256xf32> to vector<1x2x256xf32>
    tpu.vector_store %arg11[%c0_22, %c0_23, %c0_24], %25 {strides = array<i32>} : memref<1x2x256xf32, #tpu.memory_space<vmem>>, vector<1x2x256xf32>,
    return
  }
  func.func @transform_0(%arg0: i32, %arg1: i32) -> (i32, i32, i32) {
    %c0_i32 = arith.constant 0 : i32
    %c0_i32_0 = arith.constant 0 : i32
    return %arg0, %c0_i32, %arg1 : i32, i32, i32
  }
  func.func @transform_1(%arg0: i32, %arg1: i32) -> (i32, i32) {
    %c0_i32 = arith.constant 0 : i32
    %c0_i32_0 = arith.constant 0 : i32
    %c0_i32_1 = arith.constant 0 : i32
    return %c0_i32, %c0_i32_0 : i32, i32
  }
  func.func @transform_2(%arg0: i32, %arg1: i32) -> (i32, i32) {
    %c0_i32 = arith.constant 0 : i32
    %c0_i32_0 = arith.constant 0 : i32
    %c0_i32_1 = arith.constant 0 : i32
    return %c0_i32, %c0_i32_0 : i32, i32
  }
  func.func @transform_3(%arg0: i32, %arg1: i32) -> (i32, i32) {
    %c0_i32 = arith.constant 0 : i32
    %c0_i32_0 = arith.constant 0 : i32
    %c0_i32_1 = arith.constant 0 : i32
    return %c0_i32, %c0_i32_0 : i32, i32
  }
  func.func @transform_4(%arg0: i32, %arg1: i32) -> (i32, i32) {
    %c0_i32 = arith.constant 0 : i32
    %c0_i32_0 = arith.constant 0 : i32
    %c0_i32_1 = arith.constant 0 : i32
    return %c0_i32, %c0_i32_0 : i32, i32
  }
  func.func @transform_5(%arg0: i32, %arg1: i32) -> (i32, i32) {
    %c0_i32 = arith.constant 0 : i32
    %c0_i32_0 = arith.constant 0 : i32
    %c0_i32_1 = arith.constant 0 : i32
    return %c0_i32, %c0_i32_0 : i32, i32
  }
  func.func @transform_6(%arg0: i32, %arg1: i32) -> (i32, i32) {
    %c0_i32 = arith.constant 0 : i32
    %c0_i32_0 = arith.constant 0 : i32
    %c0_i32_1 = arith.constant 0 : i32
    return %c0_i32, %c0_i32_0 : i32, i32
  }
  func.func @transform_7(%arg0: i32, %arg1: i32) -> (i32, i32, i32) {
    %c0_i32 = arith.constant 0 : i32
    %c0_i32_0 = arith.constant 0 : i32
    return %arg0, %c0_i32, %arg1 : i32, i32, i32
  }
  func.func @transform_8(%arg0: i32, %arg1: i32) -> (i32, i32, i32) {
    %c0_i32 = arith.constant 0 : i32
    %c0_i32_0 = arith.constant 0 : i32
    return %arg0, %c0_i32, %arg1 : i32, i32, i32
  }
  func.func @transform_9(%arg0: i32, %arg1: i32) -> (i32, i32, i32) {
    %c0_i32 = arith.constant 0 : i32
    %c0_i32_0 = arith.constant 0 : i32
    return %arg0, %c0_i32, %arg1 : i32, i32, i32
  }
}

</mosaic_0001>

<bundles_post_ra>
// kernel: tpu_custom_call.1
= control target key start
LH: loop header
LB: loop body
LE: loop exit
PB: predicated region body
PF: predicated region fallthrough
CT: control target
= control target key end

     0   :  { %s1520_s0 = inlined_call_operand.hbm [shape: f32[2,4,256], index: 0, kind: input, shape index: {}]   ;;  %s1521_s1 = inlined_call_operand.vmem [shape: f32[2,4], index: 1, kind: input, shape index: {}]   ;;  %s1522_s2 = inlined_call_operand.vmem [shape: f32[2,1], index: 2, kind: input, shape index: {}]   ;;  %s1523_s3 = inlined_call_operand.vmem [shape: f32[2,4], index: 3, kind: input, shape index: {}]   ;;  %s1524_s4 = inlined_call_operand.vmem [shape: f32[2,1], index: 4, kind: input, shape index: {}]   ;;  %s1525_s5 = inlined_call_operand.vmem [shape: f32[2,4], index: 5, kind: input, shape index: {}]   ;;  %s1526_s6 = inlined_call_operand.vmem [shape: f32[2,1], index: 6, kind: input, shape index: {}]   ;;  %s1527_s7 = inlined_call_operand.hbm [shape: f32[2,2,256], index: 7, kind: output, shape index: {0}]   ;;  %s1528_s8 = inlined_call_operand.hbm [shape: f32[2,2,256], index: 8, kind: output, shape index: {1}]   ;;  %s1529_s9 = inlined_call_operand.hbm [shape: f32[2,2,256], index: 9, kind: output, shape index: {2}]  }
   0x1   :  { %1535 = sst [smem:[#allocation14_spill]] %s1520_s0 }
   0x2   :  { %1536 = sst [smem:[#allocation15_spill]] %s1521_s1 }
   0x3   :  { %1537 = sst [smem:[#allocation16_spill]] %s1522_s2 }
   0x4   :  { %1538 = sst [smem:[#allocation17_spill]] %s1523_s3 }
   0x5   :  { %1539 = sst [smem:[#allocation18_spill]] %s1524_s4 }
   0x6   :  { %15 = vsyncpa [#allocation3], 0 }
   0x7   :  { %17 = vsyncpa [#allocation3 + $0x1], 0 }
   0x8   :  { %18 = vsyncpa [#allocation4], 0 }
   0x9   :  { %20 = vsyncpa [#allocation4 + $0x1], 0 }
   0xa   :  { %21 = vsyncpa [#allocation7], 0 }
   0xb   :  { %23 = vsyncpa [#allocation7 + $0x1], 0  ;;  %s1237_s30 = smov 0   ;;  %s1239_s10 = smov 0  }
   0xc   :  { %s1241_s11 = smov 0   ;;  %s1243_s12 = smov 0  }
   0xd   :  { %s1245_s13 = smov 0   ;;  %s1247_s14 = smov 0  }
   0xe LB: > { %1540 = sst [smem:[#allocation12_spill]] %s1175_s13  ;;  %s1268_s15 = sadd.s32 4294967295, %s1179_s14   ;;  %s1179_s14 = sphi %s1247_s14, %s29_s14   ;;  %s1175_s13 = sphi %s1245_s13, %s1561_s13   ;;  %s1171_s12 = sphi %s1243_s12, %s1560_s12   ;;  %s1167_s11 = sphi %s1241_s11, %s1564_s11   ;;  %s1163_s10 = sphi %s1239_s10, %s1563_s10   ;;  %s1159_s30 = sphi %s1237_s30, %s1562_s30  }
   0xf   : > { %s1530_s16 = sadd.s32 4294967294, %s1179_s14   ;;  %s41_s17 = sadd.s32 1, %s1175_s13 }
  0x10   : > { %s50_s18 = sadd.s32 1, %s1167_s11  ;;  %p43_p0 = scmp.ge.s32.totalorder %s41_s17, 2 }
  0x11   : > { %p57_p1 = scmp.ne.s32.totalorder %s1167_s11, %s1163_s10  ;;  %p58_p2 = scmp.eq.s32.totalorder %s1179_s14, 0 }
  0x12   : > { %p63_p3 = scmp.ne.s32.totalorder %s1163_s10, %s1159_s30  ;;  %s1566_s17 = smov (%p43_p0, %s41_s17), 0 }
  0x13   : > { %1541 = sst [smem:[#allocation13_spill]] %s1566_s17  ;;  %p1280_p4 = por %p58_p2, %p57_p1 }
  0x14   : > { %p64_p5 = scmp.eq.s32.totalorder %s1268_s15, 0  ;;  %s45_s20 = ssub.s32 %s1175_s13, %s1566_s17 }
  0x15   : > { %p215_p6 = scmp.eq.s32.totalorder %s1268_s15, 1  ;;  %p48_p7 = scmp.eq.s32.totalorder %s45_s20, 0 }
  0x16   : > { %p1288_p8 = por %p64_p5, %p63_p3  ;;  %p221_p10 = scmp.eq.s32.totalorder %s1530_s16, 1 }
  0x17   : > { %p1292_p9 = por %p215_p6, %p57_p1  ;;  %p952_p13 = scmp.lt.s32.totalorder %s1179_s14, 2 }
  0x18   : > { %s1299_s23 = scalar_select %p48_p7, %s1167_s11, %s50_s18  }
  0x19   : > { %s1544_s22 = scalar_select %p1292_p9, 1, 0 }
  0x1a   : > { %p1301_p11 = por %p221_p10, %p63_p3  ;;  %s315_s25 = sand.u32 1, %s1167_s11  }
  0x1b   : > { %s895_s26 = sshll.u32 %s315_s25, 3  ;;  %s926_s27 = sshll.u32 %s1175_s13, 7 }
  0x1c   : > { %s1545_s24 = scalar_select %p1301_p11, 1, 0 }
  0x1d   : > { %s1546_s0 = sld [smem:[#allocation14_spill]]  ;;  %s319_s16 = scalar_lea.vmem [#allocation2], %s895_s26 }
  0x1e   : > { %s329_s18 = sshll.u32 %s319_s16, 4  ;;  %p1318_p0 = pnand %p952_p13, %p1280_p4  ;;  %s1314_s18 = int_to_ptr.vmem [resolvable:$true] %s329_s18 }
  0x1f   : > { %s316_s28 = scalar_lea.sflag [#allocation3], %s315_s25 }
  0x20   : > { %p1009_p5 = pneg %p1318_p0 }
  0x23   : > { %s1312_s20 = scalar_lea.hbm %s1546_s0, %s926_s27  ;;  %s1012_s19 = scalar_lea.hbm %s1546_s0, 256 }
  0x24   : > { %s1007_s27 = scalar_lea.hbm %s1312_s20, 128  ;;  %p1013_p4 = scmp.lt.u32.totalorder %s1312_s20, %s1546_s0 }
  0x25   : > { %p1008_p3 = scmp.ne.s32.totalorder %s1312_s20, %s1007_s27  ;;  %p1014_p10 = scmp.lt.u32.totalorder %s1012_s19, %s1007_s27 }
  0x26   : > { %p1016_p12 = scmp.lt.u32.totalorder %s1007_s27, %s1312_s20 }
  0x27   : > { %p1010_p6 = pnand %p1009_p5, %p1008_p3  ;;  %p1015_p13 = por %p1014_p10, %p1013_p4 }
  0x29   : > { %p1011_p7 = pneg %p1010_p6  ;;  %p1017_p1 = por %p1016_p12, %p1015_p13 }
  0x2b   : > { %p1018_p2 = pnand %p1017_p1, %p1011_p7 }
  0x2d   : > { %1021 = shalt.err (!%p1018_p2)
}
  0x2e   : > { %s1022_s25 = scalar_lea.vmem %s1314_s18, 128  ;;  %s1181_s16 = smov [#allocation2]  }
  0x2f   : > { %p1023_p3 = scmp.ne.s32.totalorder %s1314_s18, %s1022_s25  ;;  %s1027_s26 = sshll.u32 %s1181_s16, 4  ;;  %s1028_s26 = int_to_ptr.vmem [resolvable:$false] %s1027_s26 }
  0x30   : > { %s1029_s13 = scalar_lea.vmem %s1028_s26, 256  ;;  %p1030_p9 = scmp.lt.s32.totalorder %s1314_s18, %s1028_s26 }
  0x31   : > { %p1025_p6 = pnand %p1023_p3, %p1009_p5  ;;  %p1031_p4 = scmp.lt.s32.totalorder %s1029_s13, %s1022_s25 }
  0x33   : > { %p1026_p11 = pneg %p1025_p6  ;;  %p1032_p10 = por %p1031_p4, %p1030_p9 }
  0x35   : > { %p1033_p12 = pnand %p1032_p10, %p1026_p11 }
  0x37   : > { %1036 = shalt.err (!%p1033_p12)
}
  0x38   : > { %941 = dma.hbm_to_vmem [thread:$0]  (!%p1318_p0), %s1312_s20, 128, %s1314_s18, %s316_s28  }
  0x39   : > { %p1548_p1 = scmp.lt.s32.totalorder %s1179_s14, 3  ;;  %p1549_p2 = scmp.ge.s32.totalorder %s1179_s14, 1 }
  0x3b   : > { %p335_p5 = pnand %p1549_p2, %p1548_p1 }
  0x3c   : > { %s1354_s27 = sand.u32 (!%p335_p5), 1, %s1163_s10  }
  0x3d   : > { %338 = sbr.rel (%p335_p5) target bundleno = 356 (0x164), region = 48  ;;  %s899_s19 = sshll.u32 (!%p335_p5), %s1354_s27, 3 }
  0x3e   : > { %s341_s29 = scalar_lea.sflag (!%p335_p5), [#allocation3], %s1354_s27  ;;  %s344_s25 = scalar_lea.vmem (!%p335_p5), [#allocation2], %s899_s19 }
  0x44   : > { %1146 = dma.done.wait (%p1288_p8), %s341_s29, 128  }
  0x45   : > { %1148 = vsyncadd (%p1288_p8), %s341_s29, 4294967168  ;;  %v1182_v0 = vmov 0.0   ;;  %v1183_v1 = vmov 0   ;;  %v393_v2 = vld [vmem:[%s344_s25] sm:$0xff]  ;;  %vm407_vm0 = vcmask 1043456   ;;  %s1550_s4 = sld [smem:[#allocation18_spill]] }
  0x46   : > { %476 = vmatprep.mubr.f32.mxu0 %v1182_v0  ;;  %569 = vmatprep.mubr.f32.mxu1 %v1182_v0  ;;  %v402_v3 = vcombine.high %v393_v2, %v393_v2  ;;  %s1551_s1 = sld [smem:[#allocation15_spill]]  ;;  %vm403_vm1 = vcmask 31744   ;;  %s1552_s3 = sld [smem:[#allocation17_spill]]  ;;  %v589_v8 = vld [vmem:[%s1526_s6] sm:$0x3] }
  0x47   : > { %1004 = vset.pattern.permute.xlu0 %v1183_v1  ;;  %1005 = vset.pattern.permute.xlu1 %v1183_v1  ;;  %s1553_s2 = sld [smem:[#allocation16_spill]]  ;;  %v588_v9 = vld [vmem:[%s1525_s5] sm:$0x3]  ;;  %s1390_s20 = sshll.u32 %s1354_s27, 2 }
  0x48   : > { %903 = vmatprep.subr.msk.mxu0 %vm407_vm0, %v402_v3  ;;  %907 = vmatprep.subr.msk.mxu1 %vm407_vm0, %v402_v3  ;;  %s927_s28 = sshll.u32 %s1171_s12, 6  ;;  %s374_s21 = scalar_lea.vmem [#allocation5], %s1390_s20 }
  0x49   : > { %904 = vmatpush1.msk.msra.mxu0 %vm407_vm0, %v393_v2  ;;  %908 = vmatpush1.msk.msra.mxu1 %vm407_vm0, %v393_v2  ;;  %s708_s16 = sshll.u32 %s374_s21, 4  ;;  %s381_s26 = scalar_lea.vmem [#allocation6], %s1390_s20  ;;  %s1404_s16 = int_to_ptr.vmem [resolvable:$true] %s708_s16 }
  0x4a   : > { %911 = vmatprep.subr.msk.mxu0 %vm407_vm0, %v402_v3  ;;  %592 = vperm.xlu1 %1005, %v589_v8   ;;  %s724_s13 = sshll.u32 %s381_s26, 4  ;;  %s1534_s19 = scalar_lea.vmem [#allocation8], %s1390_s20  ;;  %s1413_s13 = int_to_ptr.vmem [resolvable:$true] %s724_s13 }
  0x4b   : > { %v496_v4 = vld [vmem:[%s1550_s4] sm:$0x3]  ;;  %s740_s29 = sshll.u32 %s1534_s19, 4  ;;  %s1402_s12 = scalar_lea.hbm %s1527_s7, %s927_s28  ;;  %s1420_s29 = int_to_ptr.vmem [resolvable:$true] %s740_s29 }
  0x4c   : > { %v394_v5 = vld [vmem:[%s1551_s1] sm:$0x3]  ;;  %499 = vperm.xlu0 %1004, %v496_v4   ;;  %s1411_s19 = scalar_lea.hbm %s1528_s8, %s927_s28  ;;  %s1418_s1 = scalar_lea.hbm %s1529_s9, %s927_s28 }
  0x4d   : > { %v495_v6 = vld [vmem:[%s1552_s3] sm:$0x3]  ;;  %905 = vmatmul.mubr.msk.f32.vlgmr.msra.gmra.mrb[0].mxu0 %vm403_vm1, %v394_v5  ;;  %s1037_s3 = scalar_lea.vmem %s1404_s16, 64  ;;  %p1554_p9 = scmp.ne.s32.totalorder %s1544_s22, 0 }
  0x4e   : > { %v395_v7 = vld [vmem:[%s1553_s2] sm:$0x3]  ;;  %909 = vmatmul.mubr.msk.f32.vlgmr.msra.gmra.mrb[0].mxu1 %vm403_vm1, %v495_v6  ;;  %912 = vmatpush1.msk.msra.mxu0 %vm407_vm0, %v393_v2  ;;  %s682_s2 = scalar_lea.sflag [#allocation4], %s1354_s27  ;;  %p1038_p8 = scmp.ne.s32.totalorder %s1404_s16, %s1037_s3 }
  0x4f   : > { %662 = vmatprep.mubr.f32.mxu0 %v1182_v0  ;;  %s1184_s0 = smov [#allocation5]  }
  0x50   : > { %398 = vperm.xlu0 %1004, %v395_v7   ;;  %p1039_p11 = pnand %p1038_p8, %p1554_p9  ;;  %s1041_s18 = sshll.u32 %s1184_s0, 4  ;;  %s1042_s18 = int_to_ptr.vmem [resolvable:$false] %s1041_s18 }
  0x51   : > { %913 = vmatmul.mubr.msk.f32.vlgmr.msra.gmra.mrb[2].mxu0 %vm403_vm1, %v588_v9  ;;  %s1043_s4 = scalar_lea.vmem %s1042_s18, 128  ;;  %p1044_p7 = scmp.lt.s32.totalorder %s1404_s16, %s1042_s18 }
  0x52   : > { %p1040_p0 = pneg %p1039_p11  ;;  %p1045_p13 = scmp.lt.s32.totalorder %s1043_s4, %s1037_s3 }
  0x54   : > { %p1046_p3 = por %p1045_p13, %p1044_p7 }
  0x56   : > { %p1047_p6 = pnand %p1046_p3, %p1040_p0 }
  0xc9   : > { %v593_v19 = vpop.permute.xlu1 %592 }
  0xcb   : > { %v500_v10 = vpop.permute.xlu0 %499 }
  0xcf   : > { %v399_v11 = vpop.permute.xlu0 %398 }
 0x120   : > { %v478_v12 = vpop.f32.mrb[0].mxu0 }
 0x121   : > { %v479_v13 = vadd.f32 %v478_v12, %v399_v11  ;;  %v480_v14 = vpop.f32.mrb[1].mxu0  ;;  %v571_v15 = vpop.f32.mrb[0].mxu1 }
 0x122   : > { %v481_v16 = vadd.f32 %v480_v14, %v399_v11  ;;  %v572_v17 = vadd.f32 %v571_v15, %v500_v10  ;;  %v573_v18 = vpop.f32.mrb[1].mxu1 }
 0x123   : > { %v574_v20 = vadd.f32 %v573_v18, %v500_v10 }
 0x124   : > { %v485_v21 = vcombine.low %v479_v13, %v481_v16  ;;  %v664_v22 = vpop.f32.mrb[2].mxu0 }
 0x125   : > { %v578_v23 = vcombine.low %v572_v17, %v574_v20  ;;  %v1406_v24 = vadd.f32 %v664_v22, %v593_v19  ;;  %v666_v25 = vpop.f32.mrb[3].mxu0 }
 0x126   : > { %v667_v26 = vadd.f32 %v666_v25, %v593_v19  ;;  %906 = vst.sshfl [vmem:[%s374_s21] sm:$0x33 pattern:$0x76325410] %v485_v21 }
 0x127   : > { %910 = vst.sshfl [vmem:[%s381_s26] sm:$0x33 pattern:$0x76325410] %v578_v23 }
 0x128   : > { %1050 = shalt.err (!%p1047_p6)
}
 0x129   : > { %s1051_s27 = scalar_lea.hbm %s1402_s12, 64  ;;  %s1055_s26 = scalar_lea.hbm %s1527_s7, 128 }
 0x12a   : > { %p1052_p4 = scmp.ne.s32.totalorder %s1402_s12, %s1051_s27  ;;  %p1056_p1 = scmp.lt.u32.totalorder %s1402_s12, %s1527_s7 }
 0x12b   : > { %p1057_p2 = scmp.lt.u32.totalorder %s1055_s26, %s1051_s27  ;;  %p1059_p8 = scmp.lt.u32.totalorder %s1051_s27, %s1402_s12 }
 0x12c   : > { %p1053_p10 = pnand %p1052_p4, %p1554_p9 }
 0x12d   : > { %p1058_p5 = por %p1057_p2, %p1056_p1 }
 0x12e   : > { %p1054_p12 = pneg %p1053_p10 }
 0x12f   : > { %p1060_p11 = por %p1059_p8, %p1058_p5 }
 0x131   : > { %p1061_p0 = pnand %p1060_p11, %p1054_p12 }
 0x133   : > { %1064 = shalt.err (!%p1061_p0)
}
 0x134   : > { %932 = dma.vmem_to_hbm [thread:$0]  (%p1554_p9), %s1404_s16, 64, %s1402_s12, %s682_s2   ;;  %v671_v27 = vcombine.low %v1406_v24, %v667_v26 }
 0x135   : > { %s1555_s3 = sand.u32 1, %s1268_s15   ;;  %s1065_s0 = scalar_lea.vmem %s1413_s13, 64 }
 0x136   : > { %s1447_s4 = scalar_lea.sflag [#allocation7], %s1555_s3  ;;  %p1066_p7 = scmp.ne.s32.totalorder %s1413_s13, %s1065_s0 }
 0x137   : > { %s1185_s18 = smov [#allocation6]  }
 0x138   : > { %p1067_p13 = pnand %p1066_p7, %p1554_p9  ;;  %s1069_s27 = sshll.u32 %s1185_s18, 4  ;;  %s1070_s27 = int_to_ptr.vmem [resolvable:$false] %s1069_s27 }
 0x139   : > { %s1071_s28 = scalar_lea.vmem %s1070_s27, 128  ;;  %p1072_p6 = scmp.lt.s32.totalorder %s1413_s13, %s1070_s27 }
 0x13a   : > { %p1068_p3 = pneg %p1067_p13  ;;  %p1073_p4 = scmp.lt.s32.totalorder %s1071_s28, %s1065_s0 }
 0x13c   : > { %p1074_p10 = por %p1073_p4, %p1072_p6 }
 0x13e   : > { %p1075_p12 = pnand %p1074_p10, %p1068_p3 }
 0x140   : > { %1078 = shalt.err (!%p1075_p12)
}
 0x141   : > { %s1079_s2 = scalar_lea.hbm %s1411_s19, 64  ;;  %s1083_s12 = scalar_lea.hbm %s1528_s8, 128 }
 0x142   : > { %p1080_p1 = scmp.ne.s32.totalorder %s1411_s19, %s1079_s2  ;;  %p1084_p8 = scmp.lt.u32.totalorder %s1411_s19, %s1528_s8 }
 0x143   : > { %p1085_p11 = scmp.lt.u32.totalorder %s1083_s12, %s1079_s2  ;;  %p1087_p7 = scmp.lt.u32.totalorder %s1079_s2, %s1411_s19 }
 0x144   : > { %p1081_p2 = pnand %p1080_p1, %p1554_p9 }
 0x145   : > { %p1086_p0 = por %p1085_p11, %p1084_p8 }
 0x146   : > { %p1082_p5 = pneg %p1081_p2 }
 0x147   : > { %p1088_p13 = por %p1087_p7, %p1086_p0 }
 0x149   : > { %p1089_p3 = pnand %p1088_p13, %p1082_p5 }
 0x14b   : > { %1092 = shalt.err (!%p1089_p3)
}
 0x14c   : > { %933 = dma.vmem_to_hbm [thread:$0]  (%p1554_p9), %s1413_s13, 64, %s1411_s19, %s1447_s4  }
 0x14d   : > { %s1556_s25 = scalar_lea.vmem [#allocation8], %s1390_s20  ;;  %s1093_s17 = scalar_lea.vmem %s1420_s29, 64 }
 0x14e   : > { %914 = vst.sshfl [vmem:[%s1556_s25] sm:$0x33 pattern:$0x76325410] %v671_v27  ;;  %p1094_p6 = scmp.ne.s32.totalorder %s1420_s29, %s1093_s17  ;;  %s1186_s3 = smov [#allocation8]  }
 0x14f   : > { %s1097_s0 = sshll.u32 %s1186_s3, 4  ;;  %s1098_s0 = int_to_ptr.vmem [resolvable:$false] %s1097_s0 }
 0x150   : > { %p1095_p4 = pnand %p1094_p6, %p1554_p9  ;;  %s1099_s18 = scalar_lea.vmem %s1098_s0, 128 }
 0x151   : > { %p1100_p12 = scmp.lt.s32.totalorder %s1420_s29, %s1098_s0  ;;  %p1101_p1 = scmp.lt.s32.totalorder %s1099_s18, %s1093_s17 }
 0x152   : > { %p1096_p10 = pneg %p1095_p4 }
 0x153   : > { %p1102_p2 = por %p1101_p1, %p1100_p12 }
 0x155   : > { %p1103_p5 = pnand %p1102_p2, %p1096_p10 }
 0x157   : > { %1106 = shalt.err (!%p1103_p5)
}
 0x158   : > { %s1107_s20 = scalar_lea.hbm %s1418_s1, 64  ;;  %s1111_s27 = scalar_lea.hbm %s1529_s9, 128 }
 0x159   : > { %p1108_p8 = scmp.ne.s32.totalorder %s1418_s1, %s1107_s20  ;;  %p1112_p7 = scmp.lt.u32.totalorder %s1418_s1, %s1529_s9 }
 0x15a   : > { %p1113_p13 = scmp.lt.u32.totalorder %s1111_s27, %s1107_s20  ;;  %p1115_p6 = scmp.lt.u32.totalorder %s1107_s20, %s1418_s1 }
 0x15b   : > { %p1109_p11 = pnand %p1108_p8, %p1554_p9 }
 0x15c   : > { %p1114_p3 = por %p1113_p13, %p1112_p7 }
 0x15d   : > { %p1110_p0 = pneg %p1109_p11 }
 0x15e   : > { %p1116_p4 = por %p1115_p6, %p1114_p3 }
 0x160   : > { %p1117_p10 = pnand %p1116_p4, %p1110_p0 }
 0x162   : > { %1120 = shalt.err (!%p1117_p10)
}
 0x163   : > { %934 = dma.vmem_to_hbm [thread:$0]  (%p1554_p9), %s1420_s29, 64, %s1418_s1, %s1447_s4  }
 0x164 PF: > { %s752_s15 = sand.u32 1, %s1159_s30   ;;  %p1557_p12 = scmp.ne.s32.totalorder %s1545_s24, 0 }
 0x165   : > { %p1558_p1 = scmp.ge.s32.totalorder %s1179_s14, 2  ;;  %s753_s16 = scalar_lea.sflag [#allocation4], %s752_s15 }
 0x167   : > { %p943_p2 = pnand %p1558_p1, %p1557_p12 }
 0x169   : > { %1150 = dma.done.wait (!%p943_p2), %s753_s16, 64  }
 0x16a   : > { %1152 = vsyncadd (!%p943_p2), %s753_s16, 4294967232  ;;  %s1559_s12 = sadd.s32 4294967294, %s1179_s14  }
 0x16b   : > { %s761_s21 = sand.u32 1, %s1559_s12  }
 0x16c   : > { %s762_s26 = scalar_lea.sflag [#allocation7], %s761_s21 }
 0x16d   : > { %1154 = dma.done.wait (!%p943_p2), %s762_s26, 128  }
 0x16e   : > { %1156 = vsyncadd (!%p943_p2), %s762_s26, 4294967168  ;;  %s29_s14 = sadd.s32 1, %s1179_s14   ;;  %s1560_s12 = sld [smem:[#allocation12_spill]] }
 0x16f   : > { %p26_p9 = scmp.ge.s32.totalorder %s29_s14, 4   ;;  %s1561_s13 = sld [smem:[#allocation13_spill]] }
 0x170   : > { %s1562_s30 = smov %s1163_s10  ;;  %s1563_s10 = smov %s1167_s11 }
 0x171   : > { %s1564_s11 = smov %s1299_s23  ;;  %28 = sbr.rel (!%p26_p9) target bundleno = 14 (0xe), region = 125 }
 0x178   :  { %776 = vsyncpa [#allocation3], 1 }
 0x179   :  { %778 = vsyncpa [#allocation3 + $0x1], 1 }
 0x17a   :  { %779 = vsyncpa [#allocation4], 1 }
 0x17b   :  { %781 = vsyncpa [#allocation4 + $0x1], 1 }
 0x17c   :  { %782 = vsyncpa [#allocation7], 1 }
 0x17d   :  { %784 = vsyncpa [#allocation7 + $0x1], 1 }

</bundles_post_ra>
